<compile_context>
chip_gen: v7x
topology: tpu7x:2x2x1
jax: 0.10.0
libtpu: 0.0.40
codegen_flags: <defaults>
</compile_context>

<pallas_src>
import math
import functools

import jax
import jax.numpy as jnp
from jax.experimental import pallas as pl
from jax.experimental.pallas import tpu as pltpu

LANES = 128
TILE_ROWS = 2048            # 2048 * 128 * 4 B = 1 MiB per input tile (x2 double-buffered)
CHUNK = TILE_ROWS * LANES   # elements per grid step
NUM_SPLITS = 2              # "parallel" leading axis; uses both TCs on v7x


def _sincos_partial_kernel(x_ref, all_ref, pos_ref, *, tile_rows):
    """Fold one (tile_rows, 128) tile into two resident (8, 128) accumulators.

    all_ref += per-lane partial sums of sin(pi/2*tanh(x))^2  (== 1 - cos^2)
    pos_ref += same, but only where x > 0.
    """
    i = pl.program_id(1)            # streaming / reduction axis (innermost)

    @pl.when(i == 0)
    def _():                        # output blocks are resident accumulators
        all_ref[...] = jnp.zeros_like(all_ref)
        pos_ref[...] = jnp.zeros_like(pos_ref)

    x = x_ref[...]                                          # (tile_rows, 128) f32
    s = jnp.sin(jnp.float32(0.5 * math.pi) * jnp.tanh(x))   # 2 EUP ops / element
    x_cos = s * s                                           # == 1 - cos(pi/2*tanh)^2
    # tanh is monotone and sign preserving -> (tanh(x) > 0) == (x > 0); using x
    # keeps the select off the transcendental dependency chain.
    x_cos_pos = jnp.where(x > 0.0, x_cos, 0.0)

    g = tile_rows // 8
    # (tile_rows,128) -> (g,8,128) regroups native (8,128) tiles; the axis-0 sum
    # is plain vreg-wise VPU adds (no cross-lane XLU work inside the loop).
    all_ref[...] += jnp.sum(x_cos.reshape(g, 8, LANES), axis=0)
    pos_ref[...] += jnp.sum(x_cos_pos.reshape(g, 8, LANES), axis=0)


def _partial_sums(x2d, splits, tiles_per_split, tile_rows):
    """Streaming reduction over the first splits*tiles_per_split*tile_rows rows."""
    kernel = functools.partial(_sincos_partial_kernel, tile_rows=tile_rows)
    out_struct = jax.ShapeDtypeStruct((splits, 8, LANES), jnp.float32)
    acc_spec = pl.BlockSpec((None, 8, LANES), lambda c, i: (c, 0, 0))
    s_all, s_pos = pl.pallas_call(
        kernel,
        out_shape=(out_struct, out_struct),
        grid=(splits, tiles_per_split),
        in_specs=[pl.BlockSpec((tile_rows, LANES),
                               lambda c, i: (c * tiles_per_split + i, 0))],
        out_specs=(acc_spec, acc_spec),
        compiler_params=pltpu.CompilerParams(
            # per-split output blocks -> safe to shard the parallel axis across
            # TensorCores (v7x megacore); the inner axis is the reduction.
            dimension_semantics=("parallel", "arbitrary")),
    )(x2d)
    # single tiny cross-lane reduction of the partials, outside the hot loop
    return jnp.sum(s_all), jnp.sum(s_pos)


def sincos_histogram(x):
    """Returns [sum(x_cos*(t<=0)), sum(x_sin), sum(x_cos*(t>0))] as (3, 1) f32."""
    n = int(x.size)
    xf = jnp.ravel(x).astype(jnp.float32)      # contiguous ravel: no copy

    s_all = jnp.float32(0.0)
    s_pos = jnp.float32(0.0)
    n_body = 0

    # Main region: consumed zero-copy with 1 MiB tiles whenever the flat size is
    # lane aligned (the usual case for feature maps).  The grid only addresses
    # full tiles, so no pad / slice of the bulk data is ever materialized.
    if n % LANES == 0:
        rows = n // LANES
        num_tiles = rows // TILE_ROWS
        if num_tiles > 0:
            splits = NUM_SPLITS if num_tiles >= NUM_SPLITS else 1
            tiles_per_split = num_tiles // splits
            x2d = xf.reshape(rows, LANES)       # free reshape, no copy
            pa, pp = _partial_sums(x2d, splits, tiles_per_split, TILE_ROWS)
            s_all = s_all + pa
            s_pos = s_pos + pp
            n_body = splits * tiles_per_split * CHUNK

    # Tail: whatever the tiled main pass did not cover.  Zero padding is
    # harmless because pad values give sin(pi/2*tanh(0))^2 == 0 and fail x > 0,
    # so both partial sums are unaffected (no mask needed).
    n_tail = n - n_body
    if n_tail > 0:
        if n_tail > CHUNK:
            # Large (e.g. lane-misaligned) leftover: pad to full 1 MiB tiles and
            # stream it -- never a single oversized VMEM block.
            padded = pl.cdiv(n_tail, CHUNK) * CHUNK
            tail = jnp.pad(xf[n_body:], (0, padded - n_tail))
            tail_rows = padded // LANES
            pa, pp = _partial_sums(tail.reshape(tail_rows, LANES),
                                   1, tail_rows // TILE_ROWS, TILE_ROWS)
        else:
            # Small leftover (< ~1 MiB): single tile, pad only to (8,128) grain.
            sub = 8 * LANES
            padded = pl.cdiv(n_tail, sub) * sub
            tail = jnp.pad(xf[n_body:], (0, padded - n_tail))
            tail_rows = padded // LANES
            pa, pp = _partial_sums(tail.reshape(tail_rows, LANES),
                                   1, 1, tail_rows)
        s_all = s_all + pa
        s_pos = s_pos + pp

    out = jnp.stack([s_all - s_pos,             # sum(x_cos * (t <= 0))
                     jnp.float32(n) - s_all,    # sum(x_sin) = n - sum(x_cos)
                     s_pos])                    # sum(x_cos * (t > 0))
    return out.reshape(3, 1)


class SinCosHistogram:
    """JAX/Pallas port of the PyTorch SinCosHistogram module."""

    def __init__(self, bins, min, max, sigma):
        self.bins = bins
        self.min = min
        self.max = max
        self.sigma = sigma
        self.delta = float(max - min) / float(bins)
        # `centers` is built in the PyTorch __init__ but never used in forward;
        # constructed deterministically here for parity (no checkpoint needed).
        self.centers = float(min) + self.delta * (
            jnp.arange(bins, dtype=jnp.float32) + 0.5)

    def __call__(self, x):
        return sincos_histogram(x)


if __name__ == "__main__":
    key = jax.random.PRNGKey(0)
    model = SinCosHistogram(bins=8, min=-1.0, max=1.0, sigma=0.05)

    def reference(x):
        # Plain-JAX reference of the exact PyTorch forward semantics.
        t = jnp.tanh(x)
        x_cos = 1.0 - jnp.cos(0.5 * math.pi * t) ** 2
        x_sin = 1.0 - jnp.sin(0.5 * math.pi * t) ** 2
        return jnp.stack([jnp.sum(x_cos * (t <= 0)),
                          jnp.sum(x_sin),
                          jnp.sum(x_cos * (t > 0))]).reshape(3, 1)

    shapes = [
        (2, 4, 16, 16),     # small NCHW feature map (single-tile tail path)
        (3, 5, 7, 11),      # ragged size            (exercises zero padding)
        (8, 4, 128, 128),   # 512K elements          (tiled main path, 2-way split)
    ]
    for idx, shape in enumerate(shapes):
        x = jax.random.normal(jax.random.fold_in(key, idx), shape,
                              dtype=jnp.float32)
        out = jax.block_until_ready(model(x))
        assert out.shape == (3, 1) and out.dtype == jnp.float32, out.shape
        ref = reference(x)
        assert jnp.allclose(out, ref, rtol=1e-4, atol=1e-2), (shape, out, ref)

    print("KERNEL_OK")
</pallas_src>

<mosaic_0001>
module attributes {stable_mosaic.version = 11 : i64} {
  func.func @_sincos_partial_kernel(%arg0: i32, %arg1: i32, %arg2: memref<16x128xf32, #tpu.memory_space<vmem>>, %arg3: memref<1x8x128xf32, #tpu.memory_space<vmem>>, %arg4: memref<1x8x128xf32, #tpu.memory_space<vmem>>) attributes {dimension_semantics = [#tpu.dimension_semantics<parallel>, #tpu.dimension_semantics<arbitrary>], iteration_bounds = array<i64: 1, 1>, scalar_prefetch = 0 : i64, scratch_operands = 0 : i64, tpu.core_type = #tpu.core_type<tc>, window_params = [{transform_indices = @transform_0, window_bounds = array<i64: 16, 128>}, {transform_indices = @transform_1, window_bounds = array<i64: 1, 8, 128>}, {transform_indices = @transform_2, window_bounds = array<i64: 1, 8, 128>}]} {
    %c0_i32 = arith.constant 0 : i32
    %0 = arith.cmpi eq, %arg1, %c0_i32 : i32
    %1 = arith.extui %0 : i1 to i32
    %c0_i32_0 = arith.constant 0 : i32
    %2 = arith.cmpi ne, %1, %c0_i32_0 : i32
    scf.if %2 {
      %cst_18 = arith.constant 0.000000e+00 : f32
      %29 = vector.broadcast %cst_18 : f32 to vector<8x128xf32>
      %c0_19 = arith.constant 0 : index
      %c0_20 = arith.constant 0 : index
      %c0_21 = arith.constant 0 : index
      %30 = vector.load %arg3[%c0_19, %c0_20, %c0_21] : memref<1x8x128xf32, #tpu.memory_space<vmem>>, vector<1x8x128xf32>
      %31 = vector.shape_cast %30 : vector<1x8x128xf32> to vector<8x128xf32>
      %32 = vector.shape_cast %29 : vector<8x128xf32> to vector<1x8x128xf32>
      tpu.vector_store %arg3[%c0_19, %c0_20, %c0_21], %32 {strides = array<i32>} : memref<1x8x128xf32, #tpu.memory_space<vmem>>, vector<1x8x128xf32>,
      %cst_22 = arith.constant 0.000000e+00 : f32
      %33 = vector.broadcast %cst_22 : f32 to vector<8x128xf32>
      %c0_23 = arith.constant 0 : index
      %c0_24 = arith.constant 0 : index
      %c0_25 = arith.constant 0 : index
      %34 = vector.load %arg4[%c0_23, %c0_24, %c0_25] : memref<1x8x128xf32, #tpu.memory_space<vmem>>, vector<1x8x128xf32>
      %35 = vector.shape_cast %34 : vector<1x8x128xf32> to vector<8x128xf32>
      %36 = vector.shape_cast %33 : vector<8x128xf32> to vector<1x8x128xf32>
      tpu.vector_store %arg4[%c0_23, %c0_24, %c0_25], %36 {strides = array<i32>} : memref<1x8x128xf32, #tpu.memory_space<vmem>>, vector<1x8x128xf32>,
    } else {
    }
    %c0 = arith.constant 0 : index
    %c0_1 = arith.constant 0 : index
    %3 = vector.load %arg2[%c0, %c0_1] : memref<16x128xf32, #tpu.memory_space<vmem>>, vector<16x128xf32>
    %4 = math.tanh %3 : vector<16x128xf32>
    %cst = arith.constant 1.57079637 : f32
    %5 = vector.broadcast %cst : f32 to vector<16x128xf32>
    %6 = arith.mulf %5, %4 : vector<16x128xf32>
    %7 = math.sin %6 : vector<16x128xf32>
    %8 = arith.mulf %7, %7 : vector<16x128xf32>
    %cst_2 = arith.constant 0.000000e+00 : f32
    %9 = vector.broadcast %cst_2 : f32 to vector<16x128xf32>
    %10 = arith.cmpf ogt, %3, %9 : vector<16x128xf32>
    %cst_3 = arith.constant 0.000000e+00 : f32
    %11 = vector.broadcast %cst_3 : f32 to vector<16x128xf32>
    %12 = arith.select %10, %8, %11 : vector<16x128xi1>, vector<16x128xf32>
    %c0_4 = arith.constant 0 : index
    %c0_5 = arith.constant 0 : index
    %c0_6 = arith.constant 0 : index
    %13 = vector.load %arg3[%c0_4, %c0_5, %c0_6] : memref<1x8x128xf32, #tpu.memory_space<vmem>>, vector<1x8x128xf32>
    %14 = vector.shape_cast %13 : vector<1x8x128xf32> to vector<8x128xf32>
    %15 = vector.shape_cast %8 : vector<16x128xf32> to vector<2x8x128xf32>
    %cst_7 = arith.constant dense<0.000000e+00> : vector<8x128xf32>
    %16 = vector.multi_reduction <add>, %15, %cst_7 [0] : vector<2x8x128xf32> to vector<8x128xf32>
    %17 = arith.addf %14, %16 : vector<8x128xf32>
    %c0_8 = arith.constant 0 : index
    %c0_9 = arith.constant 0 : index
    %c0_10 = arith.constant 0 : index
    %18 = vector.load %arg3[%c0_8, %c0_9, %c0_10] : memref<1x8x128xf32, #tpu.memory_space<vmem>>, vector<1x8x128xf32>
    %19 = vector.shape_cast %18 : vector<1x8x128xf32> to vector<8x128xf32>
    %20 = vector.shape_cast %17 : vector<8x128xf32> to vector<1x8x128xf32>
    tpu.vector_store %arg3[%c0_8, %c0_9, %c0_10], %20 {strides = array<i32>} : memref<1x8x128xf32, #tpu.memory_space<vmem>>, vector<1x8x128xf32>,
    %c0_11 = arith.constant 0 : index
    %c0_12 = arith.constant 0 : index
    %c0_13 = arith.constant 0 : index
    %21 = vector.load %arg4[%c0_11, %c0_12, %c0_13] : memref<1x8x128xf32, #tpu.memory_space<vmem>>, vector<1x8x128xf32>
    %22 = vector.shape_cast %21 : vector<1x8x128xf32> to vector<8x128xf32>
    %23 = vector.shape_cast %12 : vector<16x128xf32> to vector<2x8x128xf32>
    %cst_14 = arith.constant dense<0.000000e+00> : vector<8x128xf32>
    %24 = vector.multi_reduction <add>, %23, %cst_14 [0] : vector<2x8x128xf32> to vector<8x128xf32>
    %25 = arith.addf %22, %24 : vector<8x128xf32>
    %c0_15 = arith.constant 0 : index
    %c0_16 = arith.constant 0 : index
    %c0_17 = arith.constant 0 : index
    %26 = vector.load %arg4[%c0_15, %c0_16, %c0_17] : memref<1x8x128xf32, #tpu.memory_space<vmem>>, vector<1x8x128xf32>
    %27 = vector.shape_cast %26 : vector<1x8x128xf32> to vector<8x128xf32>
    %28 = vector.shape_cast %25 : vector<8x128xf32> to vector<1x8x128xf32>
    tpu.vector_store %arg4[%c0_15, %c0_16, %c0_17], %28 {strides = array<i32>} : memref<1x8x128xf32, #tpu.memory_space<vmem>>, vector<1x8x128xf32>,
    return
  }
  func.func @transform_0(%arg0: i32, %arg1: i32) -> (i32, i32) {
    %c1_i32 = arith.constant 1 : i32
    %0 = arith.muli %arg0, %c1_i32 : i32
    %1 = arith.addi %0, %arg1 : i32
    %c0_i32 = arith.constant 0 : i32
    %c0_i32_0 = arith.constant 0 : i32
    return %1, %c0_i32 : i32, i32
  }
  func.func @transform_1(%arg0: i32, %arg1: i32) -> (i32, i32, i32) {
    %c0_i32 = arith.constant 0 : i32
    %c0_i32_0 = arith.constant 0 : i32
    %c0_i32_1 = arith.constant 0 : i32
    return %arg0, %c0_i32, %c0_i32_0 : i32, i32, i32
  }
  func.func @transform_2(%arg0: i32, %arg1: i32) -> (i32, i32, i32) {
    %c0_i32 = arith.constant 0 : i32
    %c0_i32_0 = arith.constant 0 : i32
    %c0_i32_1 = arith.constant 0 : i32
    return %arg0, %c0_i32, %c0_i32_0 : i32, i32, i32
  }
}

</mosaic_0001>

<bundles_post_ra>
// kernel: tpu_custom_call.1
= control target key start
LH: loop header
LB: loop body
LE: loop exit
PB: predicated region body
PF: predicated region fallthrough
CT: control target
= control target key end

     0   :  { %8 = vsyncpa [#allocation3], 0  ;;  %s547_s0 = inlined_call_operand.hbm [shape: f32[16,128], index: 0, kind: input, shape index: {}]   ;;  %s548_s1 = inlined_call_operand.hbm [shape: f32[1,8,128], index: 1, kind: output, shape index: {0}]   ;;  %s549_s2 = inlined_call_operand.hbm [shape: f32[1,8,128], index: 2, kind: output, shape index: {1}]  }
   0x1   :  { %9 = vsyncpa [#allocation4], 0 }
   0x2   :  { %10 = vsyncpa [#allocation7], 0  ;;  %s407_s9 = smov [#allocation2]   ;;  %s335_s13 = scalar_lea.hbm %s547_s0, 256 }
   0x3   :  { %s20_s10 = sshll.u32 %s407_s9, 4  ;;  %p336_p0 = scmp.ne.s32.totalorder %s547_s0, %s335_s13  ;;  %s21_s10 = int_to_ptr.vmem [resolvable:$true] %s20_s10 }
   0x4   :  { %p339_p1 = scmp.lt.u32.totalorder %s335_s13, %s547_s0 }
   0x6   :  { %p341_p2 = pnand %p339_p1, %p336_p0 }
   0x8   :  { %344 = shalt.err (!%p341_p2)
}
   0x9   :  { %s345_s18 = scalar_lea.vmem %s21_s10, 256  ;;  %p350_p4 = scmp.lt.s32.totalorder %s21_s10, %s21_s10 }
   0xa   :  { %p346_p3 = scmp.ne.s32.totalorder %s21_s10, %s345_s18  ;;  %p351_p5 = scmp.lt.s32.totalorder %s345_s18, %s345_s18 }
   0xc   :  { %p352_p6 = por %p351_p5, %p350_p4 }
   0xe   :  { %p353_p7 = pnand %p352_p6, %p346_p3 }
  0x10   :  { %356 = shalt.err (!%p353_p7)
}
  0x11   :  { %s408_s19 = smov 128   ;;  %s409_s20 = smov 8  }
  0x12   :  { %26 = dma.hbm_to_vmem [thread:$0]  %s547_s0, 256, %s21_s10, [#allocation3], %s408_s19, %s408_s19, %s409_s20  }
  0x13   :  { %401 = dma.done.wait [#allocation3], 256  }
  0x14   :  { %402 = vsyncadd [#allocation3], 4294967040  ;;  %v445_v0 = vld [vmem:[#allocation2] sm:$0xff]  ;;  %v447_v1 = vld [vmem:[#allocation2 + $0x8] sm:$0xff]  ;;  %v410_v28 = vmov 683565275  }
  0x15   :  { %323 = vtanh.f32 %v445_v0  ;;  %v411_v30 = vmov 2475754826   ;;  %v412_v32 = vmov 2131351028   ;;  %v413_v34 = vmov 2102212464  }
  0x16   :  { %325 = vtanh.f32 %v447_v1  ;;  %v414_v36 = vmov 920167782   ;;  %v415_v44 = vmov 1326507024   ;;  %s416_s0 = smov [#allocation5]   ;;  %s417_s24 = smov [#allocation6]  }
  0x17   :  { %s272_s23 = sshll.u32 %s416_s0, 4  ;;  %s282_s25 = sshll.u32 %s417_s24, 4  ;;  %s273_s23 = int_to_ptr.vmem [resolvable:$true] %s272_s23  ;;  %s283_s25 = int_to_ptr.vmem [resolvable:$true] %s282_s25 }
  0x18   :  { %s357_s26 = scalar_lea.vmem %s273_s23, 128  ;;  %p362_p9 = scmp.lt.s32.totalorder %s273_s23, %s273_s23 }
  0x19   :  { %p358_p8 = scmp.ne.s32.totalorder %s273_s23, %s357_s26  ;;  %p363_p10 = scmp.lt.s32.totalorder %s357_s26, %s357_s26 }
  0x1b   :  { %p364_p11 = por %p363_p10, %p362_p9 }
  0x1d   :  { %p365_p12 = pnand %p364_p11, %p358_p8 }
  0x1f   :  { %v324_v2 = vpop.eup %323 }
  0x20   :  { %v326_v3 = vpop.eup %325  ;;  %v451_v4 = vmul.f32 1.5707964, %v324_v2 }
  0x21   :  { %v453_v5 = vmul.f32 1.5707964, %v326_v3 }
  0x22   :  { %v44_v6 = vand.u32 2147483647, %v451_v4  ;;  %v47_v7 = vand.u32 2139095040, %v451_v4  ;;  %vm46_vm14 = vcmp.lt.s32.totalorder %v451_v4, 0 }
  0x23   :  { %v148_v8 = vand.u32 2147483647, %v453_v5  ;;  %v151_v9 = vand.u32 2139095040, %v453_v5 }
  0x24   :  { %v48_v10 = vshrl.u32 %v47_v7, 23  ;;  %v51_v11 = vand.u32 8388607, %v44_v6  ;;  %vm45_vm15 = vcmp.le.f32.partialorder %v44_v6, 0.7853982 }
  0x25   :  { %v152_v12 = vshrl.u32 %v151_v9, 23  ;;  %v155_v13 = vand.u32 8388607, %v148_v8 }
  0x26   :  { %v295_v14 = vadd.s32 4294967169, %v48_v10  ;;  %v52_v17 = vor.u32 8388608, %v51_v11 }
  0x27   :  { %v299_v15 = vadd.s32 4294967169, %v152_v12  ;;  %v156_v18 = vor.u32 8388608, %v155_v13 }
  0x28   :  { %v54_v16 = vadd.s32 1, %v295_v14  ;;  %v463_v24 = vshll.u32 %v52_v17, 8 }
  0x29   :  { %v158_v19 = vadd.s32 1, %v299_v15  ;;  %v465_v26 = vshll.u32 %v156_v18, 8 }
  0x2a   :  { %vm55_vm0 = vcmp.gt.s32.totalorder %v54_v16, 0 }
  0x2b   :  { %v56_v20 = vsel %vm55_vm0, %v54_v16, 0  ;;  %vm159_vm1 = vcmp.gt.s32.totalorder %v158_v19, 0  ;;  %vm150_vm0 = vcmp.lt.s32.totalorder %v453_v5, 0 }
  0x2c   :  { %v57_v21 = vshrl.u32 %v56_v20, 5  ;;  %v58_v22 = vand.u32 31, %v56_v20  ;;  %v160_v23 = vsel %vm159_vm1, %v158_v19, 0  ;;  %vm149_vm1 = vcmp.le.f32.partialorder %v148_v8, 0.7853982 }
  0x2d   :  { %v162_v25 = vand.u32 31, %v160_v23  ;;  %v467_v38 = vshrl.u32 %v160_v23, 5 }
  0x2e   :  { %v59_v27 = vsub.s32 32, %v58_v22  ;;  %v61_v29 = vshll.u32 %v410_v28, %v58_v22  ;;  %v64_v31 = vshll.u32 %v411_v30, %v58_v22  ;;  %v67_v33 = vshll.u32 %v412_v32, %v58_v22 }
  0x2f   :  { %v70_v35 = vshll.u32 %v413_v34, %v58_v22  ;;  %v73_v37 = vshll.u32 %v414_v36, %v58_v22  ;;  %vm76_vm2 = vcmp.lt.s32.totalorder %v57_v21, 1  ;;  %vm77_vm3 = vcmp.lt.s32.totalorder %v57_v21, 2 }
  0x30   :  { %v60_v39 = vshrl.u32 %v410_v28, %v59_v27  ;;  %v62_v40 = vshrl.u32 %v411_v30, %v59_v27  ;;  %v65_v41 = vshrl.u32 %v412_v32, %v59_v27  ;;  %v68_v42 = vshrl.u32 %v413_v34, %v59_v27 }
  0x31   :  { %v71_v43 = vshrl.u32 %v414_v36, %v59_v27  ;;  %v74_v45 = vshrl.u32 %v415_v44, %v59_v27  ;;  %vm79_vm4 = vcmp.lt.s32.totalorder %v57_v21, 4  ;;  %v163_v49 = vsub.s32 32, %v162_v25 }
  0x32   :  { %v63_v46 = vor.u32 %v62_v40, %v61_v29  ;;  %v66_v47 = vor.u32 %v65_v41, %v64_v31  ;;  %v69_v48 = vor.u32 %v68_v42, %v67_v33  ;;  %vm78_vm5 = vcmp.lt.s32.totalorder %v57_v21, 3 }
  0x33   :  { %v72_v50 = vor.u32 %v71_v43, %v70_v35  ;;  %v75_v51 = vor.u32 %v74_v45, %v73_v37  ;;  %v165_v52 = vshll.u32 %v410_v28, %v162_v25  ;;  %v168_v60 = vshll.u32 %v411_v30, %v162_v25 }
  0x34   :  { %v80_v53 = vsel %vm76_vm2, %v60_v39, %v63_v46  ;;  %v81_v54 = vsel %vm79_vm4, %v69_v48, 2102212464  ;;  %v84_v55 = vsel %vm76_vm2, %v63_v46, %v66_v47  ;;  %v88_v56 = vsel %vm76_vm2, %v66_v47, %v69_v48 }
  0x35   :  { %v82_v57 = vsel %vm78_vm5, %v66_v47, %v81_v54  ;;  %v85_v58 = vsel %vm79_vm4, %v72_v50, 920167782  ;;  %v89_v59 = vsel %vm79_vm4, %v75_v51, 1326507024  ;;  %v164_v63 = vshrl.u32 %v410_v28, %v163_v49 }
  0x36   :  { %v86_v61 = vsel %vm78_vm5, %v69_v48, %v85_v58  ;;  %v90_v62 = vsel %vm78_vm5, %v72_v50, %v89_v59  ;;  %v166_v2 = vshrl.u32 %v411_v30, %v163_v49  ;;  %v83_v3 = vsel %vm77_vm3, %v80_v53, %v82_v57 }
  0x37   :  { %v87_v7 = vsel %vm77_vm3, %v84_v55, %v86_v61  ;;  %v91_v9 = vsel %vm77_vm3, %v88_v56, %v90_v62  ;;  %v169_v10 = vshrl.u32 %v412_v32, %v163_v49  ;;  %v171_v17 = vshll.u32 %v412_v32, %v162_v25 }
  0x38   :  { %v476_v11 = vmul.u32.u64.low %v463_v24, %v91_v9  ;;  %v477_v12 = vmul.u32.u64.high %v463_v24, %v91_v9, %v476_v11  ;;  %v480_v13 = vmul.u32.u64.low %v463_v24, %v87_v7  ;;  %v481_v14 = vmul.u32.u64.high %v463_v24, %v87_v7, %v480_v13 }
  0x39   :  { %v167_v15 = vor.u32 %v166_v2, %v165_v52  ;;  %v170_v16 = vor.u32 %v169_v10, %v168_v60  ;;  %v172_v18 = vshrl.u32 %v413_v34, %v163_v49  ;;  %v174_v19 = vshll.u32 %v413_v34, %v162_v25 }
  0x3a   :  { %v175_v20 = vshrl.u32 %v414_v36, %v163_v49  ;;  %v177_v22 = vshll.u32 %v414_v36, %v162_v25  ;;  %v178_v23 = vshrl.u32 %v415_v44, %v163_v49  ;;  %v99_v21 = vmul.u32 %v463_v24, %v83_v3 }
  0x3b   :  { %v173_v27 = vor.u32 %v172_v18, %v171_v17  ;;  %vm180_vm6 = vcmp.lt.s32.totalorder %v467_v38, 1  ;;  %vm181_vm7 = vcmp.lt.s32.totalorder %v467_v38, 2  ;;  %vm101_vm8 = vc.u32 %v477_v12, %v480_v13 }
  0x3c   :  { %v102_v28 = vadd.s32 1, %v481_v14  ;;  %v176_v29 = vor.u32 %v175_v20, %v174_v19  ;;  %vm182_vm9 = vcmp.lt.s32.totalorder %v467_v38, 3  ;;  %v179_v30 = vor.u32 %v178_v23, %v177_v22 }
  0x3d   :  { %vm183_vm10 = vcmp.lt.s32.totalorder %v467_v38, 4  ;;  %v184_v31 = vsel %vm180_vm6, %v164_v63, %v167_v15  ;;  %v188_v25 = vsel %vm180_vm6, %v167_v15, %v170_v16  ;;  %v192_v34 = vsel %vm180_vm6, %v170_v16, %v173_v27 }
  0x3e   :  { %v103_v32 = vsel %vm101_vm8, %v102_v28, %v481_v14  ;;  %v185_v24 = vsel %vm183_vm10, %v173_v27, 2102212464  ;;  %v189_v33 = vsel %vm183_vm10, %v176_v29, 920167782  ;;  %v193_v39 = vsel %vm183_vm10, %v179_v30, 1326507024 }
  0x3f   :  { %v104_v35 = vadd.s32 %v103_v32, %v99_v21  ;;  %v186_v36 = vsel %vm182_vm9, %v170_v16, %v185_v24  ;;  %v190_v37 = vsel %vm182_vm9, %v173_v27, %v189_v33  ;;  %v194_v42 = vsel %vm182_vm9, %v176_v29, %v193_v39 }
  0x40   :  { %v187_v40 = vsel %vm181_vm7, %v184_v31, %v186_v36  ;;  %v191_v41 = vsel %vm181_vm7, %v188_v25, %v190_v37  ;;  %v195_v44 = vsel %vm181_vm7, %v192_v34, %v194_v42  ;;  %v100_v63 = vadd.s32 %v480_v13, %v477_v12 }
  0x41   :  { %v105_v43 = vadd.s32 536870912, %v104_v35  ;;  %v498_v45 = vmul.u32.u64.low %v465_v26, %v191_v41  ;;  %v499_v46 = vmul.u32.u64.high %v465_v26, %v191_v41, %v498_v45  ;;  %v203_v50 = vmul.u32 %v465_v26, %v187_v40 }
  0x42   :  { %v502_v47 = vmul.u32.u64.low %v465_v26, %v195_v44  ;;  %v503_v48 = vmul.u32.u64.high %v465_v26, %v195_v44, %v502_v47  ;;  %vm136_vm5 = vweird.f32 %v451_v4  ;;  %vm254_vm6 = vcmp.gt.f32.partialorder %v445_v0, 0.0 }
  0x43   :  { %v106_v49 = vshrl.u32 %v105_v43, 30  ;;  %v206_v52 = vadd.s32 1, %v499_v46  ;;  %vm240_vm10 = vweird.f32 %v453_v5 }
  0x44   :  { %vm205_vm11 = vc.u32 %v503_v48, %v498_v45  ;;  %v204_v22 = vadd.s32 %v498_v45, %v503_v48 }
  0x45   :  { %v107_v51 = vshll.u32 %v106_v49, 30  ;;  %v207_v38 = vsel %vm205_vm11, %v206_v52, %v499_v46  ;;  %v130_v12 = vsub.s32 4, %v106_v49  ;;  %vm255_vm11 = vcmp.gt.f32.partialorder %v447_v1, 0.0 }
  0x46   :  { %v208_v54 = vadd.s32 %v207_v38, %v203_v50 }
  0x47   :  { %v108_v53 = vsub.s32 %v104_v35, %v107_v51  ;;  %v131_v32 = vsel %vm46_vm14, %v130_v12, %v106_v49 }
  0x48   :  { %v209_v56 = vadd.s32 536870912, %v208_v54  ;;  %v133_v36 = vsel %vm45_vm15, 0, %v131_v32 }
  0x49   :  { %v110_v55 = vsub.s32 0, %v108_v53  ;;  %v137_v42 = vadd.s32 3, %v133_v36 }
  0x4a   :  { %v210_v58 = vshrl.u32 %v209_v56, 30 }
  0x4b   :  { %v296_v57 = vmin.u32 %v110_v55, %v108_v53  ;;  %v138_v45 = vand.u32 3, %v137_v42 }
  0x4c   :  { %v211_v60 = vshll.u32 %v210_v58, 30  ;;  %v234_v41 = vsub.s32 4, %v210_v58 }
  0x4d   :  { %v112_v59 = vclz %v296_v57  ;;  %vm143_vm2 = vcmp.eq.s32.totalorder %v138_v45, 2  ;;  %vm140_vm3 = vcmp.eq.s32.totalorder %v138_v45, 0  ;;  %vm139_vm4 = vcmp.lt.s32.totalorder %v138_v45, 2 }
  0x4e   :  { %v212_v62 = vsub.s32 %v208_v54, %v211_v60  ;;  %v235_v44 = vsel %vm150_vm0, %v234_v41, %v210_v58 }
  0x4f   :  { %v297_v61 = vadd.s32 4294967294, %v112_v59  ;;  %v237_v48 = vsel %vm149_vm1, 0, %v235_v44 }
  0x50   :  { %v214_v2 = vsub.s32 0, %v212_v62  ;;  %v241_v52 = vadd.s32 3, %v237_v48 }
  0x51   :  { %vm298_vm12 = vcmp.lt.s32.totalorder %v297_v61, 0 }
  0x52   :  { %v115_v26 = vsel %vm298_vm12, 0, %v297_v61  ;;  %v300_v10 = vmin.u32 %v214_v2, %v212_v62  ;;  %v242_v55 = vand.u32 3, %v241_v52 }
  0x53   :  { %v116_v3 = vsub.s32 32, %v115_v26  ;;  %v117_v7 = vshll.u32 %v108_v53, %v115_v26  ;;  %v120_v9 = vsub.s32 4294967266, %v115_v26 }
  0x54   :  { %v216_v15 = vclz %v300_v10  ;;  %vm247_vm7 = vcmp.eq.s32.totalorder %v242_v55, 2  ;;  %vm244_vm8 = vcmp.eq.s32.totalorder %v242_v55, 0  ;;  %vm243_vm9 = vcmp.lt.s32.totalorder %v242_v55, 2 }
  0x55   :  { %v118_v11 = vshrl.u32 %v100_v63, %v116_v3  ;;  %v121_v14 = vadd.s32 127, %v120_v9 }
  0x56   :  { %v301_v18 = vadd.s32 4294967294, %v216_v15 }
  0x57   :  { %v119_v16 = vor.u32 %v118_v11, %v117_v7  ;;  %v122_v17 = vshll.u32 %v121_v14, 23 }
  0x58   :  { %vm302_vm13 = vcmp.lt.s32.totalorder %v301_v18, 0 }
  0x59   :  { %v123_v19 = vor.u32 4788187, %v122_v17  ;;  %v126_v20 = vcvt.s32.f32 %v119_v16  ;;  %v219_v13 = vsel %vm302_vm13, 0, %v301_v18 }
  0x5a   :  { %v220_v21 = vsub.s32 32, %v219_v13  ;;  %v221_v27 = vshll.u32 %v212_v62, %v219_v13  ;;  %v224_v28 = vsub.s32 4294967266, %v219_v13 }
  0x5b   :  { %v124_v23 = vand.u32 2147483647, %v123_v19 }
  0x5c   :  { %v222_v30 = vshrl.u32 %v204_v22, %v220_v21  ;;  %v225_v31 = vadd.s32 127, %v224_v28 }
  0x5d   :  { %v127_v29 = vmul.f32 %v126_v20, %v124_v23 }
  0x5e   :  { %v223_v24 = vor.u32 %v222_v30, %v221_v27  ;;  %v226_v33 = vshll.u32 %v225_v31, 23 }
  0x5f   :  { %v128_v25 = vxor.u32 2147483648, %v127_v29 }
  0x60   :  { %v227_v37 = vor.u32 4788187, %v226_v33  ;;  %v230_v39 = vcvt.s32.f32 %v223_v24 }
  0x61   :  { %v129_v34 = vsel %vm46_vm14, %v128_v25, %v127_v29 }
  0x62   :  { %v132_v35 = vsel %vm45_vm15, %v451_v4, %v129_v34  ;;  %v228_v40 = vand.u32 2147483647, %v227_v37 }
  0x63   :  { %327 = vcosq.f32 %v132_v35 }
  0x64   :  { %329 = vsinq.f32 %v132_v35  ;;  %v231_v43 = vmul.f32 %v230_v39, %v228_v40 }
  0x66   :  { %v232_v6 = vxor.u32 2147483648, %v231_v43 }
  0x68   :  { %v233_v46 = vsel %vm150_vm0, %v232_v6, %v231_v43 }
  0x69   :  { %v236_v47 = vsel %vm149_vm1, %v453_v5, %v233_v46 }
  0x6a   :  { %331 = vcosq.f32 %v236_v47 }
  0x6b   :  { %333 = vsinq.f32 %v236_v47 }
  0x6d   :  { %v328_v49 = vpop.eup %327 }
  0x6e   :  { %v330_v50 = vpop.eup %329  ;;  %v144_v51 = vxor.u32 2147483648, %v328_v49 }
  0x6f   :  { %v141_v53 = vxor.u32 2147483648, %v330_v50 }
  0x70   :  { %v145_v8 = vsel %vm143_vm2, %v144_v51, %v330_v50 }
  0x71   :  { %v142_v38 = vsel %vm140_vm3, %v328_v49, %v141_v53 }
  0x72   :  { %v146_v54 = vsel %vm139_vm4, %v142_v38, %v145_v8 }
  0x73   :  { %v147_v56 = vsel %vm136_vm5, nan, %v146_v54 }
  0x74   :  { %v252_v57 = vmul.f32 %v147_v56, %v147_v56  ;;  %v332_v58 = vpop.eup %331 }
  0x75   :  { %v334_v60 = vpop.eup %333  ;;  %v248_v61 = vxor.u32 2147483648, %v332_v58 }
  0x76   :  { %v256_v59 = vsel %vm254_vm6, %v252_v57, 0.0  ;;  %v245_v62 = vxor.u32 2147483648, %v334_v60 }
  0x77   :  { %v249_v63 = vsel %vm247_vm7, %v248_v61, %v334_v60 }
  0x78   :  { %v246_v4 = vsel %vm244_vm8, %v332_v58, %v245_v62 }
  0x79   :  { %v250_v26 = vsel %vm243_vm9, %v246_v4, %v249_v63 }
  0x7a   :  { %v251_v2 = vsel %vm240_vm10, nan, %v250_v26 }
  0x7b   :  { %v253_v3 = vmul.f32 %v251_v2, %v251_v2 }
  0x7d   :  { %v259_v0 = vadd.f32 %v253_v3, %v252_v57  ;;  %v257_v7 = vsel %vm255_vm11, %v253_v3, 0.0 }
  0x7e   :  { %v263_v9 = vadd.f32 %v257_v7, %v256_v59 }
  0x7f   :  { %261 = vst [vmem:[#allocation5] sm:$0xff] %v259_v0 }
  0x80   :  { %265 = vst [vmem:[#allocation6] sm:$0xff] %v263_v9 }
  0x81   :  { %368 = shalt.err (!%p365_p12)
}
  0x82   :  { %s369_s29 = scalar_lea.hbm %s548_s1, 128 }
  0x83   :  { %p370_p13 = scmp.ne.s32.totalorder %s548_s1, %s369_s29  ;;  %p373_p0 = scmp.lt.u32.totalorder %s369_s29, %s548_s1 }
  0x85   :  { %p375_p1 = pnand %p373_p0, %p370_p13 }
  0x87   :  { %378 = shalt.err (!%p375_p1)
}
  0x88   :  { %275 = dma.vmem_to_hbm [thread:$0]  %s273_s23, 128, %s548_s1, [#allocation4]  }
  0x89   :  { %s379_s8 = scalar_lea.vmem %s283_s25, 128  ;;  %p384_p3 = scmp.lt.s32.totalorder %s283_s25, %s283_s25 }
  0x8a   :  { %p380_p2 = scmp.ne.s32.totalorder %s283_s25, %s379_s8  ;;  %p385_p4 = scmp.lt.s32.totalorder %s379_s8, %s379_s8 }
  0x8c   :  { %p386_p5 = por %p385_p4, %p384_p3 }
  0x8e   :  { %p387_p6 = pnand %p386_p5, %p380_p2 }
  0x90   :  { %390 = shalt.err (!%p387_p6)
}
  0x91   :  { %s391_s11 = scalar_lea.hbm %s549_s2, 128 }
  0x92   :  { %p392_p7 = scmp.ne.s32.totalorder %s549_s2, %s391_s11  ;;  %p395_p8 = scmp.lt.u32.totalorder %s391_s11, %s549_s2 }
  0x94   :  { %p397_p9 = pnand %p395_p8, %p392_p7 }
  0x96   :  { %400 = shalt.err (!%p397_p9)
}
  0x97   :  { %285 = dma.vmem_to_hbm [thread:$0]  %s283_s25, 128, %s549_s2, [#allocation7]  }
  0x98   :  { %403 = dma.done.wait [#allocation4], 128  }
  0x99   :  { %404 = vsyncadd [#allocation4], 4294967168 }
  0x9a   :  { %405 = dma.done.wait [#allocation7], 128  }
  0x9b   :  { %406 = vsyncadd [#allocation7], 4294967168 }
  0x9c   :  { %292 = vsyncpa [#allocation3], 1 }
  0x9d   :  { %293 = vsyncpa [#allocation4], 1 }
  0x9e   :  { %294 = vsyncpa [#allocation7], 1 }

</bundles_post_ra>
